<compile_context>
chip_gen: v6e
topology: v6e:2x2x1
jax: 0.10.0
libtpu: 0.0.40
codegen_flags: <defaults>
</compile_context>

<pallas_src>
import functools

import jax
import jax.numpy as jnp
from jax.experimental import pallas as pl
from jax.experimental.pallas import tpu as pltpu


STATE_DIM = 2      # MountainCarContinuous-v0 observation_space.shape[0]
ACTION_DIM = 1     # MountainCarContinuous-v0 action_space.shape[0]
HIDDEN = 128
_LANE = 128


def cem_mlp_kernel(x_ref, w_ref, b2_ref, o_ref):
    # Feature-major: batch on the lane (last) axis.
    #   x_ref : (sd, tile_b)                      -- input states, lane-dense
    #   w_ref : (hid, sd + 1 + ad)                -- packed [W1 | b1 | W2]
    #   b2_ref: (ad,) in SMEM                     -- layer-2 bias scalars
    #   o_ref : (ad, tile_b)                      -- output actions, lane-dense
    x = x_ref[...]                                # (sd, tb)
    w = w_ref[...]                                # (hid, sd+1+ad)
    sd = x.shape[0]
    ad = o_ref.shape[0]

    # Static column views into the packed weight block (trace-time slices).
    w1_cols = [w[:, s:s + 1] for s in range(sd)]          # each (hid, 1)
    b1 = w[:, sd:sd + 1]                                   # (hid, 1)
    w2_cols = [w[:, sd + 1 + a:sd + 2 + a] for a in range(ad)]  # each (hid, 1)

    # Layer 1: K = sd (=2) broadcast FMAs on the VPU, one fused chain.
    # (hid,1)*(1,tb) broadcasts to (hid,tb); bias broadcasts implicitly.
    h = b1 + w1_cols[0] * x[0:1, :]
    for s in range(1, sd):                                 # static loop (sd == 2)
        h = h + w1_cols[s] * x[s:s + 1, :]
    h = jnp.maximum(h, 0.0)                                # ReLU on the VPU

    # Layer 2: N = ad (=1); elementwise scale (VPU) + cross-sublane reduce
    # (XLU) instead of an N=1 MXU matmul.  b2 is a scalar add from SMEM.
    cols = [jnp.sum(h * w2_cols[a], axis=0, keepdims=True) + b2_ref[a]
            for a in range(ad)]                            # each (1, tb)
    out = cols[0] if ad == 1 else jnp.concatenate(cols, axis=0)
    o_ref[...] = out.astype(o_ref.dtype)


def _round_up(n, m):
    return ((n + m - 1) // m) * m


def _cem_forward_impl(x, w1, b1, w2, b2, *, tile_b=4096):
    """Fused MLP forward.  x: (B, state_dim) f32 -> (B, action_dim) f32.

    Parameters in kernel layout:
      w1: (hidden, state_dim)   b1: (hidden, 1)
      w2: (hidden, action_dim)  b2: (action_dim,)
    """
    B, sd = x.shape
    hid = w1.shape[0]
    ad = w2.shape[1]

    # --- batch tile selection ---------------------------------------------
    # Single grid step whenever the lane-padded batch fits in tile_b; only
    # genuinely large batches tile (4096 lanes/step keeps the live (hid,tile)
    # f32 hidden at ~2 MiB, far inside every generation's scoped-VMEM default).
    Bp0 = _round_up(B, _LANE)
    tile_cap = max(_LANE, (tile_b // _LANE) * _LANE)
    tile = min(Bp0, tile_cap)
    Bp = _round_up(B, tile)
    grid = (Bp // tile,)

    # --- feature-major: batch on the lane axis (lane-dense in/out DMA) -----
    # Padded columns are zeroed here; their (bias-driven) outputs are sliced
    # off below -- do not remove the pad (OOB input lanes are undefined).
    x_t = x.T.astype(jnp.float32)                        # (sd, B)
    if Bp != B:
        x_t = jnp.pad(x_t, ((0, 0), (0, Bp - B)))

    # One packed resident weight operand: [W1 | b1 | W2] -> (hid, sd+1+ad).
    w_packed = jnp.concatenate(
        [w1.astype(jnp.float32), b1.astype(jnp.float32), w2.astype(jnp.float32)],
        axis=1)

    out_t = pl.pallas_call(
        cem_mlp_kernel,
        out_shape=jax.ShapeDtypeStruct((ad, Bp), jnp.float32),
        grid_spec=pltpu.PrefetchScalarGridSpec(
            num_scalar_prefetch=0,
            grid=grid,
            in_specs=[
                pl.BlockSpec((sd, tile), lambda i: (0, i)),            # x tile (lane-dense)
                pl.BlockSpec((hid, sd + 1 + ad), lambda i: (0, 0)),    # packed weights (resident)
                pl.BlockSpec(memory_space=pltpu.MemorySpace.SMEM),     # b2 scalar(s)
            ],
            out_specs=pl.BlockSpec((ad, tile), lambda i: (0, i)),      # lane-dense out
        ),
        compiler_params=pltpu.CompilerParams(
            dimension_semantics=("parallel",)),
    )(x_t, w_packed, b2.astype(jnp.float32))

    return out_t[:, :B].T                                 # (B, ad)


# jit so the transpose / pad / slice layout plumbing fuses with the kernel
# instead of being separate HBM round-trips that dominate at small B.
cem_forward = jax.jit(_cem_forward_impl, static_argnames=("tile_b",))


def init_params(key, state_dim, action_dim, hidden):
    """PyTorch nn.Linear default init: U(-1/sqrt(fan_in), 1/sqrt(fan_in)),
    stored in the kernel's feature-major-friendly layout.
    NOTE: w2 is the transpose of PyTorch fc2.weight ((out, in))."""
    k1, k2, k3, k4 = jax.random.split(key, 4)
    bound1 = 1.0 / jnp.sqrt(jnp.float32(state_dim))
    bound2 = 1.0 / jnp.sqrt(jnp.float32(hidden))
    w1 = jax.random.uniform(k1, (hidden, state_dim), jnp.float32, -bound1, bound1)
    b1 = jax.random.uniform(k2, (hidden, 1), jnp.float32, -bound1, bound1)
    w2 = jax.random.uniform(k3, (hidden, action_dim), jnp.float32, -bound2, bound2)
    b2 = jax.random.uniform(k4, (action_dim,), jnp.float32, -bound2, bound2)
    return w1, b1, w2, b2


def _reference(x, w1, b1, w2, b2):
    h = jnp.maximum(x @ w1.T + b1.T, 0.0)
    return h @ w2 + b2[None, :]


if __name__ == "__main__":
    key = jax.random.PRNGKey(0)
    kx, kp, kx2 = jax.random.split(key, 3)

    w1, b1, w2, b2 = init_params(kp, STATE_DIM, ACTION_DIM, HIDDEN)

    # A CEM fit()-style batch of elite states.  Deliberately a non-multiple of
    # 128 to exercise the wrapper-side padding; pads to 256 and runs ONE grid
    # step (single-step path -- the common case for CEM elite batches).
    batch = 200
    x = jax.random.normal(kx, (batch, STATE_DIM), jnp.float32)
    out = jax.block_until_ready(cem_forward(x, w1, b1, w2, b2))
    ref = _reference(x, w1, b1, w2, b2)
    assert out.shape == (batch, ACTION_DIM)
    assert jnp.allclose(out, ref, atol=1e-5, rtol=1e-5), "mismatch vs reference (small batch)"

    # Larger batch to exercise the multi-step tiled path (2 steps of 4096).
    batch2 = 5000
    x2 = jax.random.normal(kx2, (batch2, STATE_DIM), jnp.float32)
    out2 = jax.block_until_ready(cem_forward(x2, w1, b1, w2, b2))
    ref2 = _reference(x2, w1, b1, w2, b2)
    assert out2.shape == (batch2, ACTION_DIM)
    assert jnp.allclose(out2, ref2, atol=1e-5, rtol=1e-5), "mismatch vs reference (large batch)"

    # TODO(synk): get_action's epsilon-noise/clipping and fit()'s Adam/MSE
    # update are host-side RL plumbing, not part of the module forward kernel.
    print("KERNEL_OK")
</pallas_src>

<mosaic_0001>
module attributes {stable_mosaic.version = 11 : i64} {
  func.func @cem_mlp_kernel(%arg0: i32, %arg1: memref<2x256xf32, #tpu.memory_space<vmem>>, %arg2: memref<128x4xf32, #tpu.memory_space<vmem>>, %arg3: memref<1xf32, #tpu.memory_space<smem>>, %arg4: memref<1x256xf32, #tpu.memory_space<vmem>>) attributes {dimension_semantics = [#tpu.dimension_semantics<parallel>], iteration_bounds = array<i64: 1>, scalar_prefetch = 0 : i64, scratch_operands = 0 : i64, tpu.core_type = #tpu.core_type<tc>, window_params = [{transform_indices = @transform_0, window_bounds = array<i64: 2, 256>}, {pipeline_mode = #tpu.pipeline_mode<synchronous>, transform_indices = @transform_1, window_bounds = array<i64: 128, 4>}, {transform_indices = @transform_2, window_bounds = array<i64: 1>}, {transform_indices = @transform_3, window_bounds = array<i64: 1, 256>}]} {
    %c0 = arith.constant 0 : index
    %c0_0 = arith.constant 0 : index
    %0 = vector.load %arg1[%c0, %c0_0] : memref<2x256xf32, #tpu.memory_space<vmem>>, vector<2x256xf32>
    %c0_1 = arith.constant 0 : index
    %c0_2 = arith.constant 0 : index
    %1 = vector.load %arg2[%c0_1, %c0_2] : memref<128x4xf32, #tpu.memory_space<vmem>>, vector<128x4xf32>
    %2 = vector.extract_strided_slice %1 {offsets = [0, 0], sizes = [128, 1], strides = [1, 1]} : vector<128x4xf32> to vector<128x1xf32>
    %3 = vector.extract_strided_slice %1 {offsets = [0, 1], sizes = [128, 1], strides = [1, 1]} : vector<128x4xf32> to vector<128x1xf32>
    %4 = vector.extract_strided_slice %1 {offsets = [0, 2], sizes = [128, 1], strides = [1, 1]} : vector<128x4xf32> to vector<128x1xf32>
    %5 = vector.extract_strided_slice %1 {offsets = [0, 3], sizes = [128, 1], strides = [1, 1]} : vector<128x4xf32> to vector<128x1xf32>
    %6 = vector.extract_strided_slice %0 {offsets = [0, 0], sizes = [1, 256], strides = [1, 1]} : vector<2x256xf32> to vector<1x256xf32>
    %7 = vector.broadcast %2 : vector<128x1xf32> to vector<128x256xf32>
    %8 = vector.broadcast %6 : vector<1x256xf32> to vector<128x256xf32>
    %9 = arith.mulf %7, %8 : vector<128x256xf32>
    %10 = vector.broadcast %4 : vector<128x1xf32> to vector<128x256xf32>
    %11 = arith.addf %10, %9 : vector<128x256xf32>
    %12 = vector.extract_strided_slice %0 {offsets = [1, 0], sizes = [1, 256], strides = [1, 1]} : vector<2x256xf32> to vector<1x256xf32>
    %13 = vector.broadcast %3 : vector<128x1xf32> to vector<128x256xf32>
    %14 = vector.broadcast %12 : vector<1x256xf32> to vector<128x256xf32>
    %15 = arith.mulf %13, %14 : vector<128x256xf32>
    %16 = arith.addf %11, %15 : vector<128x256xf32>
    %cst = arith.constant 0.000000e+00 : f32
    %17 = vector.broadcast %cst : f32 to vector<128x256xf32>
    %18 = arith.maximumf %16, %17 : vector<128x256xf32>
    %19 = vector.broadcast %5 : vector<128x1xf32> to vector<128x256xf32>
    %20 = arith.mulf %18, %19 : vector<128x256xf32>
    %cst_3 = arith.constant dense<0.000000e+00> : vector<256xf32>
    %21 = vector.multi_reduction <add>, %20, %cst_3 [0] : vector<128x256xf32> to vector<256xf32>
    %22 = vector.shape_cast %21 : vector<256xf32> to vector<1x256xf32>
    %c0_4 = arith.constant 0 : index
    %23 = memref.load %arg3[%c0_4] : memref<1xf32, #tpu.memory_space<smem>>
    %24 = vector.broadcast %23 : f32 to vector<1x256xf32>
    %25 = arith.addf %22, %24 : vector<1x256xf32>
    %c0_5 = arith.constant 0 : index
    %c0_6 = arith.constant 0 : index
    %26 = vector.load %arg4[%c0_5, %c0_6] : memref<1x256xf32, #tpu.memory_space<vmem>>, vector<1x256xf32>
    tpu.vector_store %arg4[%c0_5, %c0_6], %25 {strides = array<i32>} : memref<1x256xf32, #tpu.memory_space<vmem>>, vector<1x256xf32>,
    return
  }
  func.func @transform_0(%arg0: i32) -> (i32, i32) {
    %c0_i32 = arith.constant 0 : i32
    %c0_i32_0 = arith.constant 0 : i32
    return %c0_i32, %arg0 : i32, i32
  }
  func.func @transform_1(%arg0: i32) -> (i32, i32) {
    %c0_i32 = arith.constant 0 : i32
    %c0_i32_0 = arith.constant 0 : i32
    %c0_i32_1 = arith.constant 0 : i32
    return %c0_i32, %c0_i32_0 : i32, i32
  }
  func.func @transform_2(%arg0: i32) -> i32 {
    %c0_i32 = arith.constant 0 : i32
    %c0_i32_0 = arith.constant 0 : i32
    return %c0_i32 : i32
  }
  func.func @transform_3(%arg0: i32) -> (i32, i32) {
    %c0_i32 = arith.constant 0 : i32
    %c0_i32_0 = arith.constant 0 : i32
    return %c0_i32, %arg0 : i32, i32
  }
}

</mosaic_0001>

<bundles_post_ra>
// kernel: _cem_forward_impl.1
= control target key start
LH: loop header
LB: loop body
LE: loop exit
PB: predicated region body
PF: predicated region fallthrough
CT: control target
= control target key end

     0   :  { %v629_v0 = vmov 0   ;;  %v630_v17 = vmov 2   ;;  %v631_v18 = vmov 1   ;;  %v632_v19 = vmov 3   ;;  %s984_s1 = inlined_call_operand.vmem [shape: f32[128,4], index: 1, kind: input, shape index: {}]   ;;  %s985_s0 = inlined_call_operand.vmem [shape: f32[2,256], index: 0, kind: input, shape index: {}]   ;;  %s986_s2 = inlined_call_operand.<no memory space> [shape: f32[1], index: 2, kind: input, shape index: {}]   ;;  %s987_s3 = inlined_call_operand.vmem [shape: f32[1,256], index: 3, kind: output, shape index: {}]  }
   0x1   :  { %612 = vset.pattern.permute.xlu1 %v629_v0  ;;  %611 = vset.pattern.permute.xlu0 %v629_v0  ;;  %v657_v1 = vld [vmem:[%s984_s1 + $0x10] sm:$0xff]  ;;  %v16_v2 = vld [vmem:[%s984_s1] sm:$0xff]  ;;  %v666_v3 = vld [vmem:[%s984_s1 + $0x18] sm:$0xff]  ;;  %v113_v26 = vlaneseq }
   0x2   :  { %44 = vperm.xlu1 %612, %v657_v1   ;;  %34 = vperm.xlu0 %611, %v16_v2   ;;  %v17_v4 = vld [vmem:[%s984_s1 + $0x8] sm:$0xff]  ;;  %v20_v6 = vld [vmem:[%s984_s1 + $0x20] sm:$0xff]  ;;  %v684_v7 = vld [vmem:[%s984_s1 + $0x38] sm:$0xff] }
   0x3   :  { %v675_v5 = vld [vmem:[%s984_s1 + $0x28] sm:$0xff]  ;;  %v689_v8 = vld [vmem:[%s984_s1 + $0x30] sm:$0xff]  ;;  %v701_v10 = vld [vmem:[%s984_s1 + $0x40] sm:$0xff]  ;;  %v785_v29 = vshrl.u32 %v113_v26, 7  ;;  %vm599_vm0 = vcmp.lt.s32.totalorder %v113_v26, 256 }
   0x4   :  { %v696_v9 = vld [vmem:[%s984_s1 + $0x48] sm:$0xff]  ;;  %v708_v11 = vld [vmem:[%s984_s1 + $0x58] sm:$0xff]  ;;  %v713_v12 = vld [vmem:[%s984_s1 + $0x50] sm:$0xff] }
   0x5   :  { %v720_v13 = vld [vmem:[%s984_s1 + $0x68] sm:$0xff]  ;;  %v725_v14 = vld [vmem:[%s984_s1 + $0x60] sm:$0xff]  ;;  %v732_v15 = vld [vmem:[%s984_s1 + $0x78] sm:$0xff]  ;;  %v115_v32 = vsub.s32 0, %v785_v29  ;;  %v119_v33 = vsub.s32 2, %v785_v29 }
   0x6   :  { %49 = vperm.xlu1 %612, %v666_v3   ;;  %39 = vperm.xlu0 %611, %v17_v4   ;;  %v737_v16 = vld [vmem:[%s984_s1 + $0x70] sm:$0xff]  ;;  %v797_v36 = vld [vmem:[%s985_s0] sm:$0xf] }
   0x7   :  { %v116_v37 = vrot.slane %v797_v36, %v115_v32  ;;  %v120_v38 = vrot.slane %v797_v36, %v119_v33 }
   0x9   :  { %v804_v41 = vrot.slane %v116_v37, %v115_v32  ;;  %v806_v42 = vrot.slane %v120_v38, %v115_v32 }
   0xa   :  { %59 = vperm.xlu1 %612, %v675_v5   ;;  %54 = vperm.xlu0 %611, %v20_v6  }
   0xe   :  { %69 = vperm.xlu1 %612, %v684_v7   ;;  %64 = vperm.xlu0 %611, %v689_v8  }
  0x12   :  { %79 = vperm.xlu1 %612, %v696_v9   ;;  %74 = vperm.xlu0 %611, %v701_v10  }
  0x16   :  { %89 = vperm.xlu1 %612, %v708_v11   ;;  %84 = vperm.xlu0 %611, %v713_v12  }
  0x1a   :  { %99 = vperm.xlu1 %612, %v720_v13   ;;  %94 = vperm.xlu0 %611, %v725_v14  }
  0x1e   :  { %109 = vperm.xlu1 %612, %v732_v15   ;;  %104 = vperm.xlu0 %611, %v737_v16  }
  0x22   :  { %614 = vset.pattern.permute.xlu1 %v630_v17  ;;  %613 = vset.pattern.permute.xlu0 %v630_v17 }
  0x23   :  { %168 = vperm.xlu1 %614, %v17_v4   ;;  %164 = vperm.xlu0 %613, %v16_v2  }
  0x27   :  { %172 = vperm.xlu1 %614, %v657_v1   ;;  %176 = vperm.xlu0 %613, %v666_v3  }
  0x2b   :  { %180 = vperm.xlu1 %614, %v20_v6   ;;  %184 = vperm.xlu0 %613, %v675_v5  }
  0x2f   :  { %188 = vperm.xlu1 %614, %v689_v8   ;;  %192 = vperm.xlu0 %613, %v684_v7  }
  0x33   :  { %196 = vperm.xlu1 %614, %v701_v10   ;;  %200 = vperm.xlu0 %613, %v696_v9  }
  0x37   :  { %204 = vperm.xlu1 %614, %v713_v12   ;;  %208 = vperm.xlu0 %613, %v708_v11  }
  0x3b   :  { %212 = vperm.xlu1 %614, %v725_v14   ;;  %216 = vperm.xlu0 %613, %v720_v13  }
  0x3f   :  { %220 = vperm.xlu1 %614, %v737_v16   ;;  %224 = vperm.xlu0 %613, %v732_v15  }
  0x43   :  { %615 = vset.pattern.permute.xlu1 %v631_v18  ;;  %616 = vset.pattern.permute.xlu0 %v631_v18 }
  0x44   :  { %260 = vperm.xlu1 %615, %v16_v2   ;;  %264 = vperm.xlu0 %616, %v17_v4  }
  0x48   :  { %268 = vperm.xlu1 %615, %v657_v1   ;;  %276 = vperm.xlu0 %616, %v20_v6  }
  0x4c   :  { %272 = vperm.xlu1 %615, %v666_v3   ;;  %284 = vperm.xlu0 %616, %v689_v8  }
  0x50   :  { %617 = vset.pattern.permute.xlu1 %v632_v19  ;;  %620 = vset.pattern.permute.xlu0 %v632_v19 }
  0x51   :  { %438 = vperm.xlu1 %617, %v16_v2   ;;  %442 = vperm.xlu0 %620, %v17_v4  }
  0x55   :  { %618 = vset.pattern.permute.xlu1 %v631_v18  ;;  %454 = vperm.xlu0 %620, %v20_v6  }
  0x56   :  { %280 = vperm.xlu1 %618, %v675_v5  }
  0x59   :  { %466 = vperm.xlu0 %620, %v684_v7  }
  0x5a   :  { %619 = vset.pattern.permute.xlu1 %v632_v19 }
  0x5b   :  { %446 = vperm.xlu1 %619, %v657_v1  }
  0x5d   :  { %478 = vperm.xlu0 %620, %v713_v12  }
  0x5f   :  { %450 = vperm.xlu1 %619, %v666_v3  }
  0x61   :  { %626 = vset.pattern.permute.xlu0 %v631_v18 }
  0x62   :  { %296 = vperm.xlu0 %626, %v696_v9  }
  0x63   :  { %621 = vset.pattern.permute.xlu1 %v631_v18 }
  0x64   :  { %288 = vperm.xlu1 %621, %v684_v7  }
  0x66   :  { %308 = vperm.xlu0 %626, %v725_v14  }
  0x68   :  { %292 = vperm.xlu1 %621, %v701_v10  }
  0x6a   :  { %320 = vperm.xlu0 %626, %v732_v15  }
  0x6c   :  { %622 = vset.pattern.permute.xlu1 %v632_v19 }
  0x6d   :  { %458 = vperm.xlu1 %622, %v675_v5  }
  0x6e   :  { %628 = vset.pattern.permute.xlu0 %v632_v19 }
  0x6f   :  { %494 = vperm.xlu0 %628, %v737_v16  }
  0x71   :  { %462 = vperm.xlu1 %622, %v689_v8  }
  0x75   :  { %623 = vset.pattern.permute.xlu1 %v631_v18 }
  0x76   :  { %300 = vperm.xlu1 %623, %v713_v12  }
  0x7a   :  { %304 = vperm.xlu1 %623, %v708_v11  }
  0x7d   :  { %v45_v20 = vpop.permute.xlu1 %44  ;;  %v772_v21 = vpop.permute.xlu0 %34 }
  0x7e   :  { %624 = vset.pattern.permute.xlu1 %v632_v19  ;;  %v135_v51 = vmul.f32 %v804_v41, %v45_v20  ;;  %v136_v52 = vmul.f32 %v806_v42, %v45_v20 }
  0x7f   :  { %470 = vperm.xlu1 %624, %v701_v10  }
  0x81   :  { %v775_v22 = vpop.permute.xlu1 %49  ;;  %v40_v23 = vpop.permute.xlu0 %39 }
  0x82   :  { %v133_v45 = vmul.f32 %v804_v41, %v40_v23  ;;  %v134_v46 = vmul.f32 %v806_v42, %v40_v23 }
  0x83   :  { %474 = vperm.xlu1 %624, %v696_v9  }
  0x85   :  { %v778_v24 = vpop.permute.xlu1 %59  ;;  %v55_v25 = vpop.permute.xlu0 %54 }
  0x86   :  { %v139_v55 = vmul.f32 %v804_v41, %v55_v25  ;;  %v140_v56 = vmul.f32 %v806_v42, %v55_v25 }
  0x87   :  { %625 = vset.pattern.permute.xlu1 %v631_v18 }
  0x88   :  { %312 = vperm.xlu1 %625, %v720_v13  }
  0x89   :  { %v781_v27 = vpop.permute.xlu1 %69  ;;  %v65_v28 = vpop.permute.xlu0 %64 }
  0x8a   :  { %v143_v63 = vmul.f32 %v804_v41, %v65_v28  ;;  %v144_v0 = vmul.f32 %v806_v42, %v65_v28  ;;  %v325_v28 = vsub.s32 1, %v785_v29 }
  0x8c   :  { %316 = vperm.xlu1 %625, %v737_v16  }
  0x8d   :  { %v787_v30 = vpop.permute.xlu1 %79  ;;  %v75_v31 = vpop.permute.xlu0 %74 }
  0x8e   :  { %v147_v5 = vmul.f32 %v804_v41, %v75_v31  ;;  %v148_v6 = vmul.f32 %v806_v42, %v75_v31  ;;  %v329_v31 = vsub.s32 3, %v785_v29 }
  0x90   :  { %627 = vset.pattern.permute.xlu1 %v632_v19 }
  0x91   :  { %v791_v34 = vpop.permute.xlu1 %89  ;;  %482 = vperm.xlu1 %627, %v708_v11   ;;  %v85_v35 = vpop.permute.xlu0 %84 }
  0x92   :  { %v151_v11 = vmul.f32 %v804_v41, %v85_v35  ;;  %v152_v12 = vmul.f32 %v806_v42, %v85_v35 }
  0x95   :  { %v801_v39 = vpop.permute.xlu1 %99  ;;  %486 = vperm.xlu1 %627, %v725_v14   ;;  %v95_v40 = vpop.permute.xlu0 %94 }
  0x96   :  { %v155_v17 = vmul.f32 %v804_v41, %v95_v40  ;;  %v156_v18 = vmul.f32 %v806_v42, %v95_v40 }
  0x99   :  { %v808_v43 = vpop.permute.xlu1 %109  ;;  %490 = vperm.xlu1 %627, %v720_v13   ;;  %v105_v44 = vpop.permute.xlu0 %104 }
  0x9a   :  { %v159_v32 = vmul.f32 %v804_v41, %v105_v44  ;;  %v160_v33 = vmul.f32 %v806_v42, %v105_v44  ;;  %v131_v44 = vmul.f32 %v804_v41, %v772_v21 }
  0x9d   :  { %498 = vperm.xlu1 %627, %v732_v15  }
  0x9e   :  { %v169_v47 = vpop.permute.xlu1 %168  ;;  %v165_v48 = vpop.permute.xlu0 %164 }
  0x9f   :  { %v814_v49 = vadd.f32 %v169_v47, %v133_v45  ;;  %v816_v50 = vadd.f32 %v169_v47, %v134_v46  ;;  %v326_v45 = vrot.slane %v797_v36, %v325_v28  ;;  %v330_v46 = vrot.slane %v797_v36, %v329_v31 }
  0xa2   :  { %v173_v53 = vpop.permute.xlu1 %172  ;;  %v820_v54 = vpop.permute.xlu0 %176 }
  0xa3   :  { %v824_v57 = vadd.f32 %v173_v53, %v135_v51  ;;  %v826_v58 = vadd.f32 %v173_v53, %v136_v52  ;;  %v878_v51 = vrot.slane %v326_v45, %v325_v28  ;;  %v880_v52 = vrot.slane %v330_v46, %v325_v28 }
  0xa6   :  { %v181_v59 = vpop.permute.xlu1 %180  ;;  %v828_v60 = vpop.permute.xlu0 %184 }
  0xa7   :  { %v830_v61 = vadd.f32 %v181_v59, %v139_v55  ;;  %v832_v62 = vadd.f32 %v181_v59, %v140_v56  ;;  %v132_v55 = vmul.f32 %v806_v42, %v772_v21 }
  0xaa   :  { %v189_v1 = vpop.permute.xlu1 %188  ;;  %v836_v2 = vpop.permute.xlu0 %192 }
  0xab   :  { %v838_v3 = vadd.f32 %v189_v1, %v143_v63  ;;  %v840_v4 = vadd.f32 %v189_v1, %v144_v0 }
  0xae   :  { %v197_v7 = vpop.permute.xlu1 %196  ;;  %v844_v8 = vpop.permute.xlu0 %200 }
  0xaf   :  { %v846_v9 = vadd.f32 %v197_v7, %v147_v5  ;;  %v848_v10 = vadd.f32 %v197_v7, %v148_v6  ;;  %v227_v5 = vadd.f32 %v165_v48, %v131_v44  ;;  %v228_v6 = vadd.f32 %v165_v48, %v132_v55 }
  0xb0   :  { %v138_v55 = vmul.f32 %v806_v42, %v775_v22 }
  0xb2   :  { %v205_v13 = vpop.permute.xlu1 %204  ;;  %v852_v14 = vpop.permute.xlu0 %208 }
  0xb3   :  { %v854_v15 = vadd.f32 %v205_v13, %v151_v11  ;;  %v856_v16 = vadd.f32 %v205_v13, %v152_v12 }
  0xb6   :  { %v213_v19 = vpop.permute.xlu1 %212  ;;  %v860_v20 = vpop.permute.xlu0 %216 }
  0xb7   :  { %v862_v23 = vadd.f32 %v213_v19, %v155_v17  ;;  %v864_v25 = vadd.f32 %v213_v19, %v156_v18 }
  0xba   :  { %v221_v35 = vpop.permute.xlu1 %220  ;;  %v870_v37 = vpop.permute.xlu0 %224 }
  0xbb   :  { %v872_v38 = vadd.f32 %v221_v35, %v159_v32  ;;  %v874_v40 = vadd.f32 %v221_v35, %v160_v33 }
  0xbf   :  { %v261_v47 = vpop.permute.xlu1 %260  ;;  %v265_v53 = vpop.permute.xlu0 %264 }
  0xc0   :  { %v341_v56 = vmul.f32 %v878_v51, %v261_v47  ;;  %v342_v59 = vmul.f32 %v880_v52, %v261_v47  ;;  %v343_v63 = vmul.f32 %v878_v51, %v265_v53  ;;  %v344_v36 = vmul.f32 %v880_v52, %v265_v53 }
  0xc2   :  { %v373_v7 = vadd.f32 %v341_v56, %v227_v5  ;;  %v374_v11 = vadd.f32 %v342_v59, %v228_v6  ;;  %v375_v12 = vadd.f32 %v343_v63, %v814_v49  ;;  %v376_v13 = vadd.f32 %v344_v36, %v816_v50 }
  0xc3   :  { %v269_v0 = vpop.permute.xlu1 %268  ;;  %v277_v1 = vpop.permute.xlu0 %276  ;;  %v137_v50 = vmul.f32 %v804_v41, %v775_v22  ;;  %v234_v6 = vadd.f32 %v820_v54, %v138_v55 }
  0xc4   :  { %v405_v18 = vmax.f32 %v373_v7, 0.0  ;;  %v406_v19 = vmax.f32 %v374_v11, 0.0  ;;  %v407_v28 = vmax.f32 %v375_v12, 0.0  ;;  %v408_v31 = vmax.f32 %v376_v13, 0.0 }
  0xc5   :  { %v345_v32 = vmul.f32 %v878_v51, %v269_v0  ;;  %v346_v33 = vmul.f32 %v880_v52, %v269_v0  ;;  %v233_v5 = vadd.f32 %v820_v54, %v137_v50  ;;  %v349_v7 = vmul.f32 %v878_v51, %v277_v1 }
  0xc6   :  { %v350_v11 = vmul.f32 %v880_v52, %v277_v1 }
  0xc7   :  { %v273_v17 = vpop.permute.xlu1 %272  ;;  %v285_v21 = vpop.permute.xlu0 %284  ;;  %v377_v56 = vadd.f32 %v345_v32, %v824_v57  ;;  %v378_v59 = vadd.f32 %v346_v33, %v826_v58  ;;  %v381_v58 = vadd.f32 %v349_v7, %v830_v61  ;;  %v141_v61 = vmul.f32 %v804_v41, %v778_v24 }
  0xc8   :  { %v347_v63 = vmul.f32 %v878_v51, %v273_v17  ;;  %v348_v36 = vmul.f32 %v880_v52, %v273_v17  ;;  %v145_v7 = vmul.f32 %v804_v41, %v781_v27 }
  0xc9   :  { %v409_v22 = vmax.f32 %v377_v56, 0.0 }
  0xca   :  { %v379_v12 = vadd.f32 %v347_v63, %v233_v5  ;;  %v380_v13 = vadd.f32 %v348_v36, %v234_v6  ;;  %v237_v5 = vadd.f32 %v828_v60, %v141_v61 }
  0xcc   :  { %v439_v35 = vpop.permute.xlu1 %438  ;;  %v443_v45 = vpop.permute.xlu0 %442  ;;  %v411_v33 = vmax.f32 %v379_v12, 0.0  ;;  %v353_v12 = vmul.f32 %v878_v51, %v285_v21 }
  0xcd   :  { %v501_v46 = vmul.f32 %v439_v35, %v405_v18  ;;  %v502_v48 = vmul.f32 %v439_v35, %v406_v19  ;;  %v503_v47 = vmul.f32 %v443_v45, %v407_v28  ;;  %v504_v53 = vmul.f32 %v443_v45, %v408_v31 }
  0xce   :  { %v410_v18 = vmax.f32 %v378_v59, 0.0  ;;  %v382_v19 = vadd.f32 %v350_v11, %v832_v62  ;;  %v412_v35 = vmax.f32 %v380_v13, 0.0  ;;  %v142_v62 = vmul.f32 %v806_v42, %v778_v24 }
  0xcf   :  { %v533_v44 = vadd.f32 %v503_v47, %v501_v46  ;;  %v554_v49 = vadd.f32 %v504_v53, %v502_v48  ;;  %v413_v46 = vmax.f32 %v381_v58, 0.0  ;;  %v146_v11 = vmul.f32 %v806_v42, %v781_v27 }
  0xd0   :  { %v455_v54 = vpop.permute.xlu0 %454  ;;  %v414_v48 = vmax.f32 %v382_v19, 0.0  ;;  %v238_v6 = vadd.f32 %v828_v60, %v142_v62  ;;  %v354_v24 = vmul.f32 %v880_v52, %v285_v21  ;;  %v241_v58 = vadd.f32 %v836_v2, %v145_v7 }
  0xd1   :  { %v281_v0 = vpop.permute.xlu1 %280  ;;  %v509_v53 = vmul.f32 %v455_v54, %v413_v46  ;;  %v242_v60 = vadd.f32 %v836_v2, %v146_v11  ;;  %v149_v11 = vmul.f32 %v804_v41, %v787_v30 }
  0xd2   :  { %v510_v50 = vmul.f32 %v455_v54, %v414_v48  ;;  %v386_v27 = vadd.f32 %v354_v24, %v840_v4 }
  0xd4   :  { %v467_v19 = vpop.permute.xlu0 %466  ;;  %v418_v46 = vmax.f32 %v386_v27, 0.0 }
  0xd6   :  { %v447_v57 = vpop.permute.xlu1 %446 }
  0xd7   :  { %v505_v28 = vmul.f32 %v447_v57, %v409_v22  ;;  %v506_v17 = vmul.f32 %v447_v57, %v410_v18 }
  0xd8   :  { %v479_v48 = vpop.permute.xlu0 %478 }
  0xd9   :  { %v534_v31 = vadd.f32 %v533_v44, %v505_v28  ;;  %v555_v32 = vadd.f32 %v554_v49, %v506_v17  ;;  %v351_v44 = vmul.f32 %v878_v51, %v281_v0  ;;  %v352_v49 = vmul.f32 %v880_v52, %v281_v0 }
  0xda   :  { %v451_v45 = vpop.permute.xlu1 %450  ;;  %v385_v28 = vadd.f32 %v353_v12, %v838_v3 }
  0xdb   :  { %v507_v1 = vmul.f32 %v451_v45, %v411_v33  ;;  %v508_v47 = vmul.f32 %v451_v45, %v412_v35  ;;  %v383_v13 = vadd.f32 %v351_v44, %v237_v5  ;;  %v384_v22 = vadd.f32 %v352_v49, %v238_v6 }
  0xdc   :  { %v417_v45 = vmax.f32 %v385_v28, 0.0 }
  0xdd   :  { %v535_v55 = vadd.f32 %v534_v31, %v507_v1  ;;  %v556_v56 = vadd.f32 %v555_v32, %v508_v47  ;;  %v415_v32 = vmax.f32 %v383_v13, 0.0  ;;  %v416_v21 = vmax.f32 %v384_v22, 0.0  ;;  %v297_v44 = vpop.permute.xlu0 %296 }
  0xde   :  { %v360_v12 = vmul.f32 %v880_v52, %v297_v44 }
  0xdf   :  { %v289_v59 = vpop.permute.xlu1 %288  ;;  %v536_v63 = vadd.f32 %v535_v55, %v509_v53  ;;  %v557_v36 = vadd.f32 %v556_v56, %v510_v50 }
  0xe0   :  { %v355_v0 = vmul.f32 %v878_v51, %v289_v59  ;;  %v356_v18 = vmul.f32 %v880_v52, %v289_v59 }
  0xe2   :  { %v387_v17 = vadd.f32 %v355_v0, %v241_v58  ;;  %v388_v31 = vadd.f32 %v356_v18, %v242_v60 }
  0xe3   :  { %v293_v57 = vpop.permute.xlu1 %292 }
  0xe4   :  { %v419_v1 = vmax.f32 %v387_v17, 0.0  ;;  %v420_v47 = vmax.f32 %v388_v31, 0.0  ;;  %v357_v49 = vmul.f32 %v878_v51, %v293_v57  ;;  %v358_v59 = vmul.f32 %v880_v52, %v293_v57 }
  0xe5   :  { %v245_v57 = vadd.f32 %v844_v8, %v149_v11  ;;  %v158_v11 = vmul.f32 %v806_v42, %v801_v39 }
  0xe6   :  { %v515_v3 = vmul.f32 %v467_v19, %v419_v1  ;;  %v516_v61 = vmul.f32 %v467_v19, %v420_v47  ;;  %v389_v24 = vadd.f32 %v357_v49, %v846_v9  ;;  %v390_v13 = vadd.f32 %v358_v59, %v848_v10 }
  0xe8   :  { %v459_v33 = vpop.permute.xlu1 %458  ;;  %v421_v27 = vmax.f32 %v389_v24, 0.0  ;;  %v422_v17 = vmax.f32 %v390_v13, 0.0 }
  0xe9   :  { %v511_v35 = vmul.f32 %v459_v33, %v415_v32  ;;  %v512_v54 = vmul.f32 %v459_v33, %v416_v21 }
  0xeb   :  { %v537_v53 = vadd.f32 %v536_v63, %v511_v35  ;;  %v558_v50 = vadd.f32 %v557_v36, %v512_v54  ;;  %v150_v63 = vmul.f32 %v806_v42, %v787_v30  ;;  %v359_v36 = vmul.f32 %v878_v51, %v297_v44 }
  0xec   :  { %v463_v2 = vpop.permute.xlu1 %462 }
  0xed   :  { %v513_v55 = vmul.f32 %v463_v2, %v417_v45  ;;  %v514_v56 = vmul.f32 %v463_v2, %v418_v46  ;;  %v246_v58 = vadd.f32 %v844_v8, %v150_v63  ;;  %v391_v60 = vadd.f32 %v359_v36, %v245_v57 }
  0xee   :  { %v154_v2 = vmul.f32 %v806_v42, %v791_v34  ;;  %v161_v57 = vmul.f32 %v804_v41, %v808_v43 }
  0xef   :  { %v538_v4 = vadd.f32 %v537_v53, %v513_v55  ;;  %v559_v62 = vadd.f32 %v558_v50, %v514_v56  ;;  %v392_v19 = vadd.f32 %v360_v12, %v246_v58  ;;  %v423_v32 = vmax.f32 %v391_v60, 0.0  ;;  %v309_v55 = vpop.permute.xlu0 %308 }
  0xf0   :  { %v365_v49 = vmul.f32 %v878_v51, %v309_v55  ;;  %v366_v59 = vmul.f32 %v880_v52, %v309_v55 }
  0xf1   :  { %v301_v5 = vpop.permute.xlu1 %300  ;;  %v539_v6 = vadd.f32 %v538_v4, %v515_v3  ;;  %v560_v7 = vadd.f32 %v559_v62, %v516_v61  ;;  %v424_v21 = vmax.f32 %v392_v19, 0.0 }
  0xf2   :  { %v361_v22 = vmul.f32 %v878_v51, %v301_v5  ;;  %v362_v0 = vmul.f32 %v880_v52, %v301_v5  ;;  %v397_v63 = vadd.f32 %v365_v49, %v862_v23  ;;  %v398_v36 = vadd.f32 %v366_v59, %v864_v25 }
  0xf3   :  { %v321_v12 = vpop.permute.xlu0 %320  ;;  %v254_v25 = vadd.f32 %v860_v20, %v158_v11 }
  0xf4   :  { %v393_v30 = vadd.f32 %v361_v22, %v854_v15  ;;  %v394_v28 = vadd.f32 %v362_v0, %v856_v16  ;;  %v153_v16 = vmul.f32 %v804_v41, %v791_v34  ;;  %v157_v34 = vmul.f32 %v804_v41, %v801_v39 }
  0xf5   :  { %v305_v18 = vpop.permute.xlu1 %304  ;;  %v162_v39 = vmul.f32 %v806_v42, %v808_v43  ;;  %v371_v60 = vmul.f32 %v878_v51, %v321_v12  ;;  %v372_v19 = vmul.f32 %v880_v52, %v321_v12  ;;  %v257_v43 = vadd.f32 %v870_v37, %v161_v57 }
  0xf6   :  { %v425_v33 = vmax.f32 %v393_v30, 0.0  ;;  %v426_v35 = vmax.f32 %v394_v28, 0.0  ;;  %v363_v56 = vmul.f32 %v878_v51, %v305_v18  ;;  %v364_v3 = vmul.f32 %v880_v52, %v305_v18 }
  0xf7   :  { %v249_v44 = vadd.f32 %v852_v14, %v153_v16  ;;  %v253_v23 = vadd.f32 %v860_v20, %v157_v34  ;;  %v258_v20 = vadd.f32 %v870_v37, %v162_v39  ;;  %v633_v34 = vmov 1966171168  }
  0xf8   :  { %v521_v47 = vmul.f32 %v479_v48, %v425_v33  ;;  %v522_v53 = vmul.f32 %v479_v48, %v426_v35  ;;  %v250_v48 = vadd.f32 %v852_v14, %v154_v2  ;;  %v583_v11 = vunpack.c.l.s4 %v633_v34 }
  0xf9   :  { %v395_v5 = vadd.f32 %v363_v56, %v249_v44 }
  0xfa   :  { %v471_v9 = vpop.permute.xlu1 %470 }
  0xfb   :  { %v517_v31 = vmul.f32 %v471_v9, %v421_v27  ;;  %v518_v10 = vmul.f32 %v471_v9, %v422_v17  ;;  %v427_v0 = vmax.f32 %v395_v5, 0.0  ;;  %v429_v9 = vmax.f32 %v397_v63, 0.0 }
  0xfd   :  { %v540_v54 = vadd.f32 %v539_v6, %v517_v31  ;;  %v561_v45 = vadd.f32 %v560_v7, %v518_v10  ;;  %v396_v6 = vadd.f32 %v364_v3, %v250_v48  ;;  %v430_v31 = vmax.f32 %v398_v36, 0.0 }
  0xfe   :  { %v475_v46 = vpop.permute.xlu1 %474 }
  0xff   :  { %v519_v1 = vmul.f32 %v475_v46, %v423_v32  ;;  %v520_v8 = vmul.f32 %v475_v46, %v424_v21  ;;  %v428_v18 = vmax.f32 %v396_v6, 0.0 }
 0x101   :  { %v541_v50 = vadd.f32 %v540_v54, %v519_v1  ;;  %v562_v15 = vadd.f32 %v561_v45, %v520_v8  ;;  %v403_v54 = vadd.f32 %v371_v60, %v257_v43  ;;  %v404_v45 = vadd.f32 %v372_v19, %v258_v20 }
 0x103   :  { %v313_v61 = vpop.permute.xlu1 %312  ;;  %v542_v4 = vadd.f32 %v541_v50, %v521_v47  ;;  %v563_v62 = vadd.f32 %v562_v15, %v522_v53  ;;  %v495_v53 = vpop.permute.xlu0 %494  ;;  %v436_v16 = vmax.f32 %v404_v45, 0.0 }
 0x104   :  { %v367_v14 = vmul.f32 %v878_v51, %v313_v61  ;;  %v368_v24 = vmul.f32 %v880_v52, %v313_v61 }
 0x106   :  { %v399_v27 = vadd.f32 %v367_v14, %v253_v23  ;;  %v400_v17 = vadd.f32 %v368_v24, %v254_v25  ;;  %v584_v24 = vunpack.c.0.s8 %v583_v11 }
 0x107   :  { %v317_v7 = vpop.permute.xlu1 %316 }
 0x108   :  { %v369_v13 = vmul.f32 %v878_v51, %v317_v7  ;;  %v370_v22 = vmul.f32 %v880_v52, %v317_v7  ;;  %v431_v52 = vmax.f32 %v399_v27, 0.0  ;;  %v432_v35 = vmax.f32 %v400_v17, 0.0 }
 0x109   :  { %v587_v39 = vsub.s32 %v584_v24, %v785_v29 }
 0x10a   :  { %v401_v32 = vadd.f32 %v369_v13, %v872_v38  ;;  %v402_v42 = vadd.f32 %v370_v22, %v874_v40  ;;  %v435_v40 = vmax.f32 %v403_v54, 0.0 }
 0x10c   :  { %v483_v58 = vpop.permute.xlu1 %482  ;;  %v433_v46 = vmax.f32 %v401_v32, 0.0  ;;  %v434_v1 = vmax.f32 %v402_v42, 0.0 }
 0x10d   :  { %v523_v30 = vmul.f32 %v483_v58, %v427_v0  ;;  %v524_v28 = vmul.f32 %v483_v58, %v428_v18  ;;  %v576_v0 = vstv %s986_s2 }
 0x10e   :  { %v529_v2 = vmul.f32 %v495_v53, %v433_v46  ;;  %v530_v55 = vmul.f32 %v495_v53, %v434_v1 }
 0x10f   :  { %v543_v10 = vadd.f32 %v542_v4, %v523_v30  ;;  %v564_v41 = vadd.f32 %v563_v62, %v524_v28 }
 0x110   :  { %v487_v21 = vpop.permute.xlu1 %486 }
 0x111   :  { %v525_v51 = vmul.f32 %v487_v21, %v429_v9  ;;  %v526_v33 = vmul.f32 %v487_v21, %v430_v31 }
 0x113   :  { %v544_v8 = vadd.f32 %v543_v10, %v525_v51  ;;  %v565_v47 = vadd.f32 %v564_v41, %v526_v33 }
 0x114   :  { %v491_v50 = vpop.permute.xlu1 %490 }
 0x115   :  { %v527_v38 = vmul.f32 %v491_v50, %v431_v52  ;;  %v528_v15 = vmul.f32 %v491_v50, %v432_v35 }
 0x117   :  { %v545_v37 = vadd.f32 %v544_v8, %v527_v38  ;;  %v566_v56 = vadd.f32 %v565_v47, %v528_v15 }
 0x118   :  { %v499_v3 = vpop.permute.xlu1 %498 }
 0x119   :  { %v531_v61 = vmul.f32 %v499_v3, %v435_v40  ;;  %v532_v4 = vmul.f32 %v499_v3, %v436_v16  ;;  %v546_v62 = vadd.f32 %v545_v37, %v529_v2  ;;  %v567_v44 = vadd.f32 %v566_v56, %v530_v55 }
 0x11b   :  { %v547_v48 = vadd.f32 %v546_v62, %v531_v61  ;;  %v568_v49 = vadd.f32 %v567_v44, %v532_v4 }
 0x11d   :  { %v548_v59 = vrot.slane %v547_v48, 4  ;;  %v569_v5 = vrot.slane %v568_v49, 4 }
 0x11f   :  { %v549_v6 = vadd.f32 %v548_v59, %v547_v48  ;;  %v570_v7 = vadd.f32 %v569_v5, %v568_v49 }
 0x121   :  { %v550_v63 = vrot.slane %v549_v6, 2  ;;  %v571_v36 = vrot.slane %v570_v7, 2 }
 0x123   :  { %v551_v12 = vadd.f32 %v550_v63, %v549_v6  ;;  %v572_v14 = vadd.f32 %v571_v36, %v570_v7 }
 0x125   :  { %v552_v13 = vrot.slane %v551_v12, 1  ;;  %v573_v22 = vrot.slane %v572_v14, 1 }
 0x127   :  { %v553_v18 = vadd.f32 %v552_v13, %v551_v12  ;;  %v574_v57 = vadd.f32 %v573_v22, %v572_v14 }
 0x129   :  { %v577_v23 = vadd.f32 %v576_v0, %v553_v18  ;;  %v578_v25 = vadd.f32 %v576_v0, %v574_v57 }
 0x12b   :  { %v581_v58 = vcombine.low %v577_v23, %v578_v25 }
 0x12d   :  { %v588_v60 = vrot.slane %v581_v58, %v587_v39 }
 0x12f   :  { %v595_v19 = vrot.slane %v588_v60, %v587_v39 }
 0x131   :  { %601 = vst.msk [vmem:[%s987_s3] sm:$0x3] %vm599_vm0, %v595_v19 }

</bundles_post_ra>
